<compile_context>
chip_gen: v7x
topology: tpu7x:2x2x1
jax: 0.10.0
libtpu: 0.0.40
codegen_flags: <defaults>
</compile_context>

<pallas_src>
import functools

import jax
import jax.numpy as jnp
from jax import lax
from jax.experimental import pallas as pl
from jax.experimental.pallas import tpu as pltpu

BN_EPS = 1e-5
_KH = _KW = 3
_STRIDE = 2
_PAD = 1
_K_PAD = 32          # 3*3*3 = 27 im2col rows, padded to a sublane multiple


# --------------------------------------------------------------------------- #
# Kernels
# --------------------------------------------------------------------------- #
def _conv_stats_kernel(p_ref, w_ref, y_ref, s1_ref, s2_ref):
    """Pass 1: conv-as-matmul (MXU) + per-tile partial BN statistics.

    p_ref  : (NB, Kp, TM)   bf16  transposed im2col patches (lane-dense, ReLU'd)
    w_ref  : (C, Kp)        bf16  conv weight in matmul form
    y_ref  : (NB, C, TM)    bf16  conv output tile (pre-BN, f32-accumulated)
    s1_ref : (1, 1, C, 1)   f32   per-tile per-channel sum(y)
    s2_ref : (1, 1, C, 1)   f32   per-tile per-channel sum(y*y)
    """
    w = w_ref[...]
    nb = p_ref.shape[0]
    s1 = None
    s2 = None
    for b in range(nb):                                   # static unroll
        y = jnp.dot(w, p_ref[b], preferred_element_type=jnp.float32)  # (C, TM)
        y_ref[b] = y.astype(y_ref.dtype)                  # bf16 HBM round trip
        t1 = jnp.sum(y, axis=1, keepdims=True)            # (C, 1) f32
        t2 = jnp.sum(y * y, axis=1, keepdims=True)
        s1 = t1 if s1 is None else s1 + t1
        s2 = t2 if s2 is None else s2 + t2
    s1_ref[...] = s1[None, None]
    s2_ref[...] = s2[None, None]


def _bn_apply_kernel(y_ref, s1_ref, s2_ref, g_ref, b_ref, o_ref, *, inv_cnt):
    """Pass 2: reduce partial stats in-kernel, fold BN affine, normalize.

    y_ref  : (NB, C, TM)        bf16  pre-BN conv output tile
    s1_ref : (GB, GM, C, 1)     f32   all per-tile sums       (full array)
    s2_ref : (GB, GM, C, 1)     f32   all per-tile sum-sqs    (full array)
    g_ref  : (C, 1)             f32   BN gamma
    b_ref  : (C, 1)             f32   BN beta
    o_ref  : (NB, C, TM)        f32   normalized output tile
    """
    s1 = jnp.sum(s1_ref[...], axis=(0, 1))                # (C, 1) global sum
    s2 = jnp.sum(s2_ref[...], axis=(0, 1))
    mean = s1 * inv_cnt
    var = jnp.maximum(s2 * inv_cnt - mean * mean, 0.0)    # biased (PyTorch train)
    inv = lax.rsqrt(var + BN_EPS)                         # EUP
    scale = g_ref[...] * inv                              # (C, 1)
    shift = b_ref[...] - mean * scale
    o_ref[...] = y_ref[...].astype(jnp.float32) * scale + shift


# --------------------------------------------------------------------------- #
# Host-side planning / layout glue
# --------------------------------------------------------------------------- #
def _round_up(x, m):
    return -(-x // m) * m


def _plan(n, m, cout, *, max_cols=16384, target_step_bytes=2 << 20):
    """Choose (NB images / block, batch grid, TM columns / block, M grid, M_pad)."""
    # ---- M tiling: lane-dense (multiple of 128), prefer divisors of m --------
    cap = max(128, (max_cols // 128) * 128)
    m128 = _round_up(m, 128)
    if m128 <= cap:
        tm = m128                                   # one full-M tile (padded)
    else:
        tm = 0
        for k in range(cap // 128, 0, -1):          # largest 128-multiple divisor
            if m % (k * 128) == 0:
                tm = k * 128
                break
        if tm == 0:
            tm = cap                                # no divisor: pad M up to cap
    m_pad = _round_up(m, tm)
    gm = m_pad // tm

    # ---- batch folding: push per-step DMA toward target, keep >= 2 steps ----
    step_bytes_per_img = tm * (_K_PAD * 2 + cout * 2)     # patches + y, bf16
    nb = 1
    for cand in range(n, 0, -1):
        if n % cand:
            continue
        steps = (n // cand) * gm
        if steps < 2 and n * gm >= 2:               # keep both v7x cores busy
            continue
        if cand * step_bytes_per_img <= target_step_bytes or cand == 1:
            nb = cand
            break
    gb = n // nb

    # Single-image / single-tile input: split M so a parallel axis has 2 steps.
    if gb * gm == 1 and m_pad >= 256 and tm % 256 == 0:
        tm //= 2
        gm = 2
    return nb, gb, tm, gm, m_pad


def _build_patches(x_nchw, m_pad):
    """(N, Cin, H, W) f32 -> (N, Kp, M_pad) bf16 ReLU'd im2col patches (+Ho,Wo).

    K ordering is (kh, kw, cin), matching the weight reshape in stem_forward;
    zero-padded to _K_PAD rows and M_pad columns (zeros are neutral for both
    the matmul and the BN statistics).
    """
    n, cin, h, w = x_nchw.shape
    ho = (h + 2 * _PAD - _KH) // _STRIDE + 1
    wo = (w + 2 * _PAD - _KW) // _STRIDE + 1
    xr = jnp.maximum(x_nchw, 0.0)                         # ReLU on raw f32
    xp = jnp.pad(xr, ((0, 0), (0, 0), (_PAD, _PAD), (_PAD, _PAD)))
    xp = xp.astype(jnp.bfloat16)
    taps = []
    for i in range(_KH):
        for j in range(_KW):
            taps.append(xp[:, :, i:i + _STRIDE * (ho - 1) + 1:_STRIDE,
                               j:j + _STRIDE * (wo - 1) + 1:_STRIDE])
    p = jnp.stack(taps, axis=1)                           # (N, 9, Cin, Ho, Wo)
    p = p.reshape(n, _KH * _KW * cin, ho * wo)            # (N, 27, M)
    k = _KH * _KW * cin
    p = jnp.pad(p, ((0, 0), (0, _K_PAD - k), (0, m_pad - ho * wo)))
    return p, ho, wo


def stem_forward(x_nchw, conv_w, bn_gamma, bn_beta):
    """AmoebaNet Stem forward (training-mode BatchNorm with affine params).

    x_nchw: (N, 3, H, W) f32;  conv_w: (C, 3, 3, 3) PyTorch OIHW layout.
    """
    n, cin, h, w = x_nchw.shape
    cout = conv_w.shape[0]
    ho = (h + 2 * _PAD - _KH) // _STRIDE + 1
    wo = (w + 2 * _PAD - _KW) // _STRIDE + 1
    m = ho * wo

    nb, gb, tm, gm, m_pad = _plan(n, m, cout)

    patches, _, _ = _build_patches(x_nchw, m_pad)         # (N, Kp, M_pad) bf16

    # OIHW -> (O, kh, kw, cin) -> (C, K) -> pad K to Kp; matches patch ordering.
    w_t = jnp.transpose(conv_w, (0, 2, 3, 1)).reshape(cout, _KH * _KW * cin)
    w_t = jnp.pad(w_t, ((0, 0), (0, _K_PAD - _KH * _KW * cin))).astype(jnp.bfloat16)

    gamma = bn_gamma.astype(jnp.float32).reshape(cout, 1)
    beta = bn_beta.astype(jnp.float32).reshape(cout, 1)

    params = pltpu.CompilerParams(
        dimension_semantics=("parallel", "parallel"),
        vmem_limit_bytes=32 * 1024 * 1024)

    # ---- pass 1: conv (MXU, bf16 in / f32 acc) + partial BN statistics ------
    p1_bytes = (patches.size * 2 + w_t.size * 2
                + n * cout * m_pad * 2 + 2 * gb * gm * cout * 4)
    y, s1, s2 = pl.pallas_call(
        _conv_stats_kernel,
        grid=(gb, gm),
        in_specs=[
            pl.BlockSpec((nb, _K_PAD, tm), lambda b, mi: (b, 0, mi)),
            pl.BlockSpec((cout, _K_PAD), lambda b, mi: (0, 0)),
        ],
        out_specs=(
            pl.BlockSpec((nb, cout, tm), lambda b, mi: (b, 0, mi)),
            pl.BlockSpec((1, 1, cout, 1), lambda b, mi: (b, mi, 0, 0)),
            pl.BlockSpec((1, 1, cout, 1), lambda b, mi: (b, mi, 0, 0)),
        ),
        out_shape=(
            jax.ShapeDtypeStruct((n, cout, m_pad), jnp.bfloat16),
            jax.ShapeDtypeStruct((gb, gm, cout, 1), jnp.float32),
            jax.ShapeDtypeStruct((gb, gm, cout, 1), jnp.float32),
        ),
        compiler_params=params,
        cost_estimate=pl.CostEstimate(
            flops=2 * n * m_pad * _K_PAD * cout,
            transcendentals=0,
            bytes_accessed=p1_bytes),
    )(patches, w_t)

    # ---- pass 2: in-kernel global-stat reduction + folded BN, fully parallel -
    inv_cnt = 1.0 / float(n * m)                          # unpadded element count
    p2_bytes = n * cout * m_pad * (2 + 4) + 2 * gb * gm * cout * 4 + 2 * cout * 4
    out = pl.pallas_call(
        functools.partial(_bn_apply_kernel, inv_cnt=inv_cnt),
        grid=(gb, gm),
        in_specs=[
            pl.BlockSpec((nb, cout, tm), lambda b, mi: (b, 0, mi)),
            pl.BlockSpec((gb, gm, cout, 1), lambda b, mi: (0, 0, 0, 0)),
            pl.BlockSpec((gb, gm, cout, 1), lambda b, mi: (0, 0, 0, 0)),
            pl.BlockSpec((cout, 1), lambda b, mi: (0, 0)),
            pl.BlockSpec((cout, 1), lambda b, mi: (0, 0)),
        ],
        out_specs=pl.BlockSpec((nb, cout, tm), lambda b, mi: (b, 0, mi)),
        out_shape=jax.ShapeDtypeStruct((n, cout, m_pad), jnp.float32),
        compiler_params=params,
        cost_estimate=pl.CostEstimate(
            flops=2 * n * cout * m_pad,
            transcendentals=cout,
            bytes_accessed=p2_bytes),
    )(y, s1, s2, gamma, beta)

    # (N, C, M) is already NCHW order -> slice off the M padding + free reshape.
    return out[:, :, :m].reshape(n, cout, ho, wo)


# --------------------------------------------------------------------------- #
# Reference & test
# --------------------------------------------------------------------------- #
def _reference(x_nchw, conv_w, bn_gamma, bn_beta):
    # Mirror the kernel's bf16 rounding of the MXU inputs (f32 accumulation in
    # both paths), so the comparison isolates the kernel structure.
    xr = jnp.maximum(x_nchw, 0.0).astype(jnp.bfloat16).astype(jnp.float32)
    wr = conv_w.astype(jnp.bfloat16).astype(jnp.float32)
    y = lax.conv_general_dilated(
        xr, wr, window_strides=(_STRIDE, _STRIDE),
        padding=((_PAD, _PAD), (_PAD, _PAD)),
        dimension_numbers=("NCHW", "OIHW", "NCHW"),
        preferred_element_type=jnp.float32)
    mean = jnp.mean(y, axis=(0, 2, 3), keepdims=True)
    var = jnp.mean((y - mean) ** 2, axis=(0, 2, 3), keepdims=True)
    yhat = (y - mean) * lax.rsqrt(var + BN_EPS)
    return yhat * bn_gamma.reshape(1, -1, 1, 1) + bn_beta.reshape(1, -1, 1, 1)


if __name__ == "__main__":
    key = jax.random.PRNGKey(0)
    k_x, k_w = jax.random.split(key)

    N, CIN, H, W = 2, 3, 16, 16      # Conv2d(3, channels, ...) -> Cin fixed at 3
    CHANNELS = 4

    x = jax.random.normal(k_x, (N, CIN, H, W), dtype=jnp.float32)
    conv_w = jax.random.normal(k_w, (CHANNELS, CIN, 3, 3), dtype=jnp.float32) * 0.1
    bn_gamma = jnp.ones((CHANNELS,), dtype=jnp.float32)   # BatchNorm2d default init
    bn_beta = jnp.zeros((CHANNELS,), dtype=jnp.float32)

    out = jax.block_until_ready(stem_forward(x, conv_w, bn_gamma, bn_beta))
    ref = jax.block_until_ready(_reference(x, conv_w, bn_gamma, bn_beta))

    assert out.shape == (N, CHANNELS, H // 2, W // 2), out.shape
    max_err = float(jnp.max(jnp.abs(out - ref)))
    # y round-trips HBM in bf16 between the two passes -> loosened tolerance.
    assert jnp.allclose(out, ref, atol=2e-2, rtol=2e-2), max_err

    print("KERNEL_OK")
</pallas_src>

<mosaic_0001>
module attributes {stable_mosaic.version = 11 : i64} {
  func.func @_conv_stats_kernel(%arg0: i32, %arg1: i32, %arg2: memref<1x32x128xbf16, #tpu.memory_space<vmem>>, %arg3: memref<4x32xbf16, #tpu.memory_space<vmem>>, %arg4: memref<1x4x128xbf16, #tpu.memory_space<vmem>>, %arg5: memref<1x1x4x1xf32, #tpu.memory_space<vmem>>, %arg6: memref<1x1x4x1xf32, #tpu.memory_space<vmem>>) attributes {dimension_semantics = [#tpu.dimension_semantics<parallel>, #tpu.dimension_semantics<parallel>], iteration_bounds = array<i64: 2, 1>, scalar_prefetch = 0 : i64, scratch_operands = 0 : i64, tpu.core_type = #tpu.core_type<tc>, window_params = [{transform_indices = @transform_0, window_bounds = array<i64: 1, 32, 128>}, {pipeline_mode = #tpu.pipeline_mode<synchronous>, transform_indices = @transform_1, window_bounds = array<i64: 4, 32>}, {transform_indices = @transform_2, window_bounds = array<i64: 1, 4, 128>}, {transform_indices = @transform_3, window_bounds = array<i64: 1, 1, 4, 1>}, {transform_indices = @transform_4, window_bounds = array<i64: 1, 1, 4, 1>}]} {
    %c0 = arith.constant 0 : index
    %c0_0 = arith.constant 0 : index
    %0 = vector.load %arg3[%c0, %c0_0] : memref<4x32xbf16, #tpu.memory_space<vmem>>, vector<4x32xbf16>
    %c0_1 = arith.constant 0 : index
    %c0_2 = arith.constant 0 : index
    %c0_3 = arith.constant 0 : index
    %1 = vector.load %arg2[%c0_1, %c0_2, %c0_3] : memref<1x32x128xbf16, #tpu.memory_space<vmem>>, vector<1x32x128xbf16>
    %2 = vector.shape_cast %1 : vector<1x32x128xbf16> to vector<32x128xbf16>
    %cst = arith.constant dense<0.000000e+00> : vector<4x128xf32>
    %3 = tpu.matmul %0, %2, %cst {dimension_numbers = #tpu.dot_dimension_numbers<[1], [0], [0], [1], [0, 0, 1, 1], [], []>} : vector<4x32xbf16>, vector<32x128xbf16>, vector<4x128xf32> -> vector<4x128xf32>
    %4 = arith.truncf %3 : vector<4x128xf32> to vector<4x128xbf16>
    %c0_4 = arith.constant 0 : index
    %c0_5 = arith.constant 0 : index
    %c0_6 = arith.constant 0 : index
    %5 = vector.load %arg4[%c0_4, %c0_5, %c0_6] : memref<1x4x128xbf16, #tpu.memory_space<vmem>>, vector<1x4x128xbf16>
    %6 = vector.shape_cast %5 : vector<1x4x128xbf16> to vector<4x128xbf16>
    %7 = vector.shape_cast %4 : vector<4x128xbf16> to vector<1x4x128xbf16>
    tpu.vector_store %arg4[%c0_4, %c0_5, %c0_6], %7 {strides = array<i32>} : memref<1x4x128xbf16, #tpu.memory_space<vmem>>, vector<1x4x128xbf16>,
    %cst_7 = arith.constant dense<0.000000e+00> : vector<4xf32>
    %8 = vector.multi_reduction <add>, %3, %cst_7 [1] : vector<4x128xf32> to vector<4xf32>
    %9 = vector.shape_cast %8 : vector<4xf32> to vector<4x1xf32>
    %10 = arith.mulf %3, %3 : vector<4x128xf32>
    %cst_8 = arith.constant dense<0.000000e+00> : vector<4xf32>
    %11 = vector.multi_reduction <add>, %10, %cst_8 [1] : vector<4x128xf32> to vector<4xf32>
    %12 = vector.shape_cast %11 : vector<4xf32> to vector<4x1xf32>
    %13 = vector.shape_cast %9 : vector<4x1xf32> to vector<1x1x4x1xf32>
    %c0_9 = arith.constant 0 : index
    %c0_10 = arith.constant 0 : index
    %c0_11 = arith.constant 0 : index
    %c0_12 = arith.constant 0 : index
    %14 = vector.load %arg5[%c0_9, %c0_10, %c0_11, %c0_12] : memref<1x1x4x1xf32, #tpu.memory_space<vmem>>, vector<1x1x4x1xf32>
    tpu.vector_store %arg5[%c0_9, %c0_10, %c0_11, %c0_12], %13 {strides = array<i32>} : memref<1x1x4x1xf32, #tpu.memory_space<vmem>>, vector<1x1x4x1xf32>,
    %15 = vector.shape_cast %12 : vector<4x1xf32> to vector<1x1x4x1xf32>
    %c0_13 = arith.constant 0 : index
    %c0_14 = arith.constant 0 : index
    %c0_15 = arith.constant 0 : index
    %c0_16 = arith.constant 0 : index
    %16 = vector.load %arg6[%c0_13, %c0_14, %c0_15, %c0_16] : memref<1x1x4x1xf32, #tpu.memory_space<vmem>>, vector<1x1x4x1xf32>
    tpu.vector_store %arg6[%c0_13, %c0_14, %c0_15, %c0_16], %15 {strides = array<i32>} : memref<1x1x4x1xf32, #tpu.memory_space<vmem>>, vector<1x1x4x1xf32>,
    return
  }
  func.func @transform_0(%arg0: i32, %arg1: i32) -> (i32, i32, i32) {
    %c0_i32 = arith.constant 0 : i32
    %c0_i32_0 = arith.constant 0 : i32
    return %arg0, %c0_i32, %arg1 : i32, i32, i32
  }
  func.func @transform_1(%arg0: i32, %arg1: i32) -> (i32, i32) {
    %c0_i32 = arith.constant 0 : i32
    %c0_i32_0 = arith.constant 0 : i32
    %c0_i32_1 = arith.constant 0 : i32
    return %c0_i32, %c0_i32_0 : i32, i32
  }
  func.func @transform_2(%arg0: i32, %arg1: i32) -> (i32, i32, i32) {
    %c0_i32 = arith.constant 0 : i32
    %c0_i32_0 = arith.constant 0 : i32
    return %arg0, %c0_i32, %arg1 : i32, i32, i32
  }
  func.func @transform_3(%arg0: i32, %arg1: i32) -> (i32, i32, i32, i32) {
    %c0_i32 = arith.constant 0 : i32
    %c0_i32_0 = arith.constant 0 : i32
    %c0_i32_1 = arith.constant 0 : i32
    return %arg0, %arg1, %c0_i32, %c0_i32_0 : i32, i32, i32, i32
  }
  func.func @transform_4(%arg0: i32, %arg1: i32) -> (i32, i32, i32, i32) {
    %c0_i32 = arith.constant 0 : i32
    %c0_i32_0 = arith.constant 0 : i32
    %c0_i32_1 = arith.constant 0 : i32
    return %arg0, %arg1, %c0_i32, %c0_i32_0 : i32, i32, i32, i32
  }
}

</mosaic_0001>

<bundles_post_ra>
// kernel: tpu_custom_call.1
= control target key start
LH: loop header
LB: loop body
LE: loop exit
PB: predicated region body
PF: predicated region fallthrough
CT: control target
= control target key end

     0   :  { %10 = vsyncpa [#allocation3], 0  ;;  %s946_s0 = inlined_call_operand.hbm [shape: bf16[2,32,128], index: 0, kind: input, shape index: {}]   ;;  %s947_s1 = inlined_call_operand.vmem [shape: bf16[4,32], index: 1, kind: input, shape index: {}]   ;;  %s948_s2 = inlined_call_operand.hbm [shape: bf16[2,4,128], index: 2, kind: output, shape index: {0}]   ;;  %s949_s3 = inlined_call_operand.vmem [shape: f32[2,1,4,1], index: 3, kind: output, shape index: {1}]   ;;  %s950_s4 = inlined_call_operand.vmem [shape: f32[2,1,4,1], index: 4, kind: output, shape index: {2}]  }
   0x1   :  { %12 = vsyncpa [#allocation3 + $0x1], 0 }
   0x2   :  { %13 = vsyncpa [#allocation4], 0 }
   0x3   :  { %15 = vsyncpa [#allocation4 + $0x1], 0  ;;  %s767_s15 = smov 0   ;;  %s769_s16 = smov 0  }
   0x4   :  { %s771_s17 = smov 0   ;;  %s773_s18 = smov 0  }
   0x5   :  { %s775_s19 = smov 0   ;;  %s777_s20 = smov 0  }
   0x6 LB: > { %s523_s21 = sadd.s32 4294967295, %s734_s20   ;;  %s524_s22 = sadd.s32 4294967294, %s734_s20   ;;  %s734_s20 = sphi %s777_s20, %s21_s20   ;;  %s730_s19 = sphi %s775_s19, %s965_s19   ;;  %s726_s18 = sphi %s773_s18, %s964_s18   ;;  %s722_s17 = sphi %s771_s17, %s963_s17   ;;  %s718_s16 = sphi %s769_s16, %s962_s16   ;;  %s714_s15 = sphi %s767_s15, %s961_s15  }
   0x7   : > { %s33_s23 = sadd.s32 1, %s730_s19  ;;  %s42_s24 = sadd.s32 1, %s722_s17 }
   0x8   : > { %p35_p0 = scmp.ge.s32.totalorder %s33_s23, 2  ;;  %p49_p1 = scmp.ne.s32.totalorder %s722_s17, %s718_s16 }
   0x9   : > { %p50_p2 = scmp.eq.s32.totalorder %s734_s20, 0  ;;  %p55_p3 = scmp.ne.s32.totalorder %s718_s16, %s714_s15 }
   0xa   : > { %s967_s23 = smov (%p35_p0, %s33_s23), 0  ;;  %p56_p5 = scmp.eq.s32.totalorder %s523_s21, 0 }
   0xb   : > { %p808_p4 = por %p50_p2, %p49_p1  ;;  %s37_s26 = ssub.s32 %s730_s19, %s967_s23 }
   0xc   : > { %p102_p6 = scmp.eq.s32.totalorder %s523_s21, 1  ;;  %p40_p7 = scmp.eq.s32.totalorder %s37_s26, 0 }
   0xd   : > { %p814_p8 = por %p56_p5, %p55_p3  ;;  %p108_p10 = scmp.eq.s32.totalorder %s524_s22, 1 }
   0xe   : > { %p818_p9 = por %p102_p6, %p49_p1  ;;  %p566_p13 = scmp.lt.s32.totalorder %s734_s20, 2 }
   0xf   : > { %s823_s29 = scalar_select %p40_p7, %s722_s17, %s42_s24  }
  0x10   : > { %s954_s28 = scalar_select %p818_p9, 1, 0 }
  0x11   : > { %p825_p11 = por %p108_p10, %p55_p3  ;;  %s187_s5 = sand.u32 1, %s722_s17  }
  0x12   : > { %s527_s6 = sshll.u32 %s187_s5, 4  ;;  %s542_s7 = sshll.u32 %s730_s19, 8 }
  0x13   : > { %s955_s30 = scalar_select %p825_p11, 1, 0 }
  0x14   : > { %s836_s10 = scalar_lea.hbm %s946_s0, %s542_s7  ;;  %s191_s11 = scalar_lea.vmem [#allocation2], %s527_s6 }
  0x15   : > { %s199_s12 = sshll.u32 %s191_s11, 4  ;;  %p842_p0 = pnand %p566_p13, %p808_p4  ;;  %s838_s12 = int_to_ptr.vmem [resolvable:$true] %s199_s12 }
  0x16   : > { %s847_s14 = scalar_lea.sflag [#allocation3], %s187_s5  ;;  %s622_s21 = scalar_lea.hbm %s836_s10, 256 }
  0x17   : > { %p623_p2 = scmp.ne.s32.totalorder %s836_s10, %s622_s21  ;;  %p624_p3 = pneg %p842_p0 }
  0x18   : > { %s627_s25 = scalar_lea.hbm %s946_s0, 512  ;;  %p628_p4 = scmp.lt.u32.totalorder %s836_s10, %s946_s0 }
  0x19   : > { %p625_p5 = pnand %p624_p3, %p623_p2  ;;  %p629_p7 = scmp.lt.u32.totalorder %s627_s25, %s622_s21 }
  0x1a   : > { %p631_p13 = scmp.lt.u32.totalorder %s622_s21, %s836_s10 }
  0x1b   : > { %p626_p6 = pneg %p625_p5  ;;  %p630_p10 = por %p629_p7, %p628_p4 }
  0x1d   : > { %p632_p12 = por %p631_p13, %p630_p10 }
  0x1f   : > { %p633_p1 = pnand %p632_p12, %p626_p6 }
  0x21   : > { %636 = shalt.err (!%p633_p1)
}
  0x22   : > { %s637_s5 = scalar_lea.vmem %s838_s12, 256  ;;  %s736_s7 = smov [#allocation2]  }
  0x23   : > { %p638_p2 = scmp.ne.s32.totalorder %s838_s12, %s637_s5  ;;  %s642_s8 = sshll.u32 %s736_s7, 4  ;;  %s643_s8 = int_to_ptr.vmem [resolvable:$false] %s642_s8 }
  0x24   : > { %s644_s9 = scalar_lea.vmem %s643_s8, 512  ;;  %p645_p9 = scmp.lt.s32.totalorder %s838_s12, %s643_s8 }
  0x25   : > { %p640_p5 = pnand %p638_p2, %p624_p3  ;;  %p646_p4 = scmp.lt.s32.totalorder %s644_s9, %s637_s5 }
  0x27   : > { %p641_p11 = pneg %p640_p5  ;;  %p647_p7 = por %p646_p4, %p645_p9 }
  0x29   : > { %p648_p10 = pnand %p647_p7, %p641_p11 }
  0x2b   : > { %651 = shalt.err (!%p648_p10)
}
  0x2c   : > { %s737_s11 = smov 64   ;;  %s738_s21 = smov 4  }
  0x2d   : > { %561 = dma.hbm_to_vmem [thread:$0]  (!%p842_p0), %s836_s10, 256, %s838_s12, %s847_s14, %s737_s11, %s737_s11, %s738_s21  }
  0x2e   : > { %p207_p12 = scmp.lt.s32.totalorder %s734_s20, 3  ;;  %p957_p1 = scmp.ge.s32.totalorder %s734_s20, 1 }
  0x30   : > { %p208_p3 = pnand %p957_p1, %p207_p12 }
  0x31   : > { %s879_s22 = sand.u32 (!%p208_p3), 1, %s718_s16  }
  0x32   : > { %211 = sbr.rel (%p208_p3) target bundleno = 427 (0x1ab), region = 28  ;;  %s531_s24 = sshll.u32 (!%p208_p3), %s879_s22, 4 }
  0x33   : > { %s214_s25 = scalar_lea.sflag (!%p208_p3), [#allocation3], %s879_s22  ;;  %s217_s26 = scalar_lea.vmem (!%p208_p3), [#allocation2], %s531_s24 }
  0x39   : > { %705 = dma.done.wait (%p814_p8), %s214_s25, 256  }
  0x3a   : > { %707 = vsyncadd (%p814_p8), %s214_s25, 4294967040  ;;  %v739_v0 = vmov 0.0   ;;  %vm740_vm0 = vmmov 0   ;;  %v620_v1 = vld [vmem:[%s217_s26] sm:$0xff]   ;;  %v621_v2 = vld [vmem:[%s217_s26 + $0x8] sm:$0xff]   ;;  %vm288_vm1 = vcmask 261120  }
  0x3b   : > { %546 = vmatprep.subr.bf16.mxu0 %v739_v0  ;;  %550 = vmatprep.mubr.msk.bf16.mxu0 %vm740_vm0, %v739_v0  ;;  %v271_v3 = vld [vmem:[%s947_s1] sm:$0x3]  ;;  %s532_s13 = sshll.u32 %s879_s22, 1  ;;  %vm334_vm2 = vcmask 1043456   ;;  %s539_s14 = sshll.u32 %s726_s18, 5 }
  0x3c   : > { %547 = vmatpush3.bf16.msra.mxu0 %v620_v1  ;;  %s237_s27 = scalar_lea.vmem [#allocation5], %s532_s13  ;;  %s895_s8 = scalar_lea.hbm %s948_s2, %s539_s14 }
  0x3d   : > { %548 = vmatprep.subr.bf16.mxu0 %v739_v0  ;;  %s374_s6 = sshll.u32 %s237_s27, 4  ;;  %s346_s9 = scalar_lea.sflag [#allocation4], %s879_s22  ;;  %s375_s6 = int_to_ptr.vmem [resolvable:$true] %s374_s6 }
  0x3e   : > { %s652_s11 = scalar_lea.vmem %s375_s6, 32  ;;  %p958_p9 = scmp.ne.s32.totalorder %s954_s28, 0 }
  0x3f   : > { %p653_p8 = scmp.ne.s32.totalorder %s375_s6, %s652_s11  ;;  %s741_s21 = smov [#allocation5]  }
  0x40   : > { %549 = vmatpush3.bf16.msra.mxu0 %v621_v2  ;;  %s656_s24 = sshll.u32 %s741_s21, 4  ;;  %s657_s24 = int_to_ptr.vmem [resolvable:$false] %s656_s24 }
  0x41   : > { %p654_p11 = pnand %p653_p8, %p958_p9  ;;  %s658_s25 = scalar_lea.vmem %s657_s24, 64 }
  0x42   : > { %p659_p6 = scmp.lt.s32.totalorder %s375_s6, %s657_s24  ;;  %p660_p13 = scmp.lt.s32.totalorder %s658_s25, %s652_s11 }
  0x43   : > { %551 = vmatmul.mubr.msk.bf16.vlgmr.msra.gmra.mrb[0].mxu0 %vm288_vm1, %v271_v3  ;;  %p655_p0 = pneg %p654_p11 }
  0x44   : > { %p661_p2 = por %p660_p13, %p659_p6 }
  0x46   : > { %p662_p5 = pnand %p661_p2, %p655_p0 }
 0x116   : > { %v326_v4 = vpop.f32.mrb[0].mxu0 }
 0x117   : > { %v332_v5 = vpack.c.bf16 %v326_v4, %v326_v4  ;;  %v552_v6 = vpop.f32.mrb[1].mxu0  ;;  %v335_v7 = vsel %vm334_vm2, %v326_v4, 0.0  ;;  %v338_v8 = vmul.f32 %v326_v4, %v326_v4 }
 0x118   : > { %336 = vadd.xlane.f32.xlu0 %v335_v7  ;;  %v329_v9 = vpop.f32.mrb[2].mxu0 }
 0x119   : > { %v553_v10 = vpop.f32.mrb[3].mxu0  ;;  %333 = vst [vmem:[%s237_s27] sm:$0x3] %v332_v5  ;;  %v339_v11 = vsel %vm334_vm2, %v338_v8, 0.0 }
 0x11c   : > { %340 = vadd.xlane.f32.xlu0 %v339_v11 }
 0x11d   : > { %665 = shalt.err (!%p662_p5)
}
 0x11e   : > { %s666_s22 = scalar_lea.hbm %s895_s8, 32  ;;  %s670_s12 = scalar_lea.hbm %s948_s2, 64 }
 0x11f   : > { %p667_p4 = scmp.ne.s32.totalorder %s895_s8, %s666_s22  ;;  %p671_p12 = scmp.lt.u32.totalorder %s895_s8, %s948_s2 }
 0x120   : > { %p672_p1 = scmp.lt.u32.totalorder %s670_s12, %s666_s22  ;;  %p674_p8 = scmp.lt.u32.totalorder %s666_s22, %s895_s8 }
 0x121   : > { %p668_p7 = pnand %p667_p4, %p958_p9 }
 0x122   : > { %p673_p3 = por %p672_p1, %p671_p12 }
 0x123   : > { %p669_p10 = pneg %p668_p7 }
 0x124   : > { %p675_p11 = por %p674_p8, %p673_p3 }
 0x126   : > { %p676_p0 = pnand %p675_p11, %p669_p10 }
 0x128   : > { %679 = shalt.err (!%p676_p0)
}
 0x129   : > { %556 = dma.vmem_to_hbm [thread:$0]  (%p958_p9), %s375_s6, 32, %s895_s8, %s346_s9   ;;  %vm342_vm3 = vcmask 3072  }
 0x12a   : > { %p256_p6 = scmp.lt.s32.totalorder %s726_s18, 1 }
 0x12c   : > { %s969_s18 = smov (!%p256_p6, %s726_s18), 1 }
 0x12d   : > { %s533_s14 = sshll.u32 %s969_s18, 2 }
 0x12e   : > { %s262_s11 = scalar_lea.vmem %s949_s3, %s533_s14  ;;  %s269_s25 = scalar_lea.vmem %s950_s4, %s533_s14 }
 0x1a5   : > { %v337_v12 = vpop.xlane.xlu0 %336 }
 0x1a6   : > { %343 = vst.msk [vmem:[%s262_s11] sm:$0xf] %vm342_vm3, %v337_v12 }
 0x1a9   : > { %v341_v13 = vpop.xlane.xlu0 %340 }
 0x1aa   : > { %344 = vst.msk [vmem:[%s269_s25] sm:$0xf] %vm342_vm3, %v341_v13 }
 0x1ab PF: > { %s392_s28 = sand.u32 1, %s714_s15   ;;  %p959_p9 = scmp.ne.s32.totalorder %s955_s30, 0 }
 0x1ac   : > { %p960_p13 = scmp.ge.s32.totalorder %s734_s20, 2  ;;  %s393_s18 = scalar_lea.sflag [#allocation4], %s392_s28 }
 0x1ae   : > { %p563_p2 = pnand %p960_p13, %p959_p9 }
 0x1b0   : > { %709 = dma.done.wait (!%p563_p2), %s393_s18, 32  }
 0x1b1   : > { %711 = vsyncadd (!%p563_p2), %s393_s18, 4294967264  ;;  %s21_s20 = sadd.s32 1, %s734_s20   ;;  %s961_s15 = smov %s718_s16 }
 0x1b2   : > { %p18_p5 = scmp.ge.s32.totalorder %s21_s20, 4   ;;  %s962_s16 = smov %s722_s17 }
 0x1b3   : > { %s963_s17 = smov %s823_s29  ;;  %s964_s18 = smov %s730_s19 }
 0x1b4   : > { %s965_s19 = smov %s967_s23  ;;  %20 = sbr.rel (!%p18_p5) target bundleno = 6 (0x6), region = 97 }
 0x1bb   :  { %418 = vsyncpa [#allocation3], 1 }
 0x1bc   :  { %420 = vsyncpa [#allocation3 + $0x1], 1 }
 0x1bd   :  { %421 = vsyncpa [#allocation4], 1 }
 0x1be   :  { %423 = vsyncpa [#allocation4 + $0x1], 1 }

</bundles_post_ra>
